<compile_context>
chip_gen: v6e
topology: v6e:2x2x1
jax: 0.10.0
libtpu: 0.0.40
codegen_flags: <defaults>
</compile_context>

<pallas_src>
import jax
import jax.numpy as jnp
from jax.experimental import pallas as pl
from jax.experimental.pallas import tpu as pltpu


# ---------------------------------------------------------------------------
# Pallas kernel: one MXU mat-vec (mat-thin-mat) per row tile.
# ---------------------------------------------------------------------------
def _atomic_energies_kernel(x_ref, w_ref, o_ref):
    # x_ref: (tm, L)   w_ref: (L, R)   o_ref: (tm, R)
    o_ref[...] = jnp.dot(
        x_ref[...], w_ref[...], preferred_element_type=jnp.float32
    ).astype(o_ref.dtype)


def _round_up(a, b):
    return ((a + b - 1) // b) * b


# ---------------------------------------------------------------------------
# Pallas wrapper
# ---------------------------------------------------------------------------
def atomic_energies_forward(x, atomic_energies):
    """x: [N, E], atomic_energies: [E]  ->  [N] (same dtype as x)."""
    N, E = x.shape
    assert atomic_energies.shape == (E,)
    energies = atomic_energies.astype(jnp.float32)

    # ---- lane-dense packing: R original rows per 128-lane row --------------
    if E <= 128 and 128 % E == 0:
        R = 128 // E
    else:
        R = 1                      # generic fallback: plain (N, E) x (E, 1)
    L = E * R

    # Block-diagonal segment weights: W[j*E + k, j] = energies[k].
    w = jnp.kron(jnp.eye(R, dtype=jnp.float32), energies.reshape(E, 1))
    w = w.astype(x.dtype)          # single MXU dtype; f32 accumulation in-kernel

    # Zero-copy reshape to the lane-dense view (pad a few rows if N % R != 0).
    n_pad = _round_up(N, R)
    x_p = x if n_pad == N else jnp.pad(x, ((0, n_pad - N), (0, 0)))
    x_view = x_p.reshape(n_pad // R, L)
    M = n_pad // R

    # ---- tile sizing --------------------------------------------------------
    # 16384 lane-rows * 128 lanes * 4 B = 8 MiB per f32 buffer -> ~16 MiB
    # double-buffered: fits v7x's scoped-VMEM budget with room to spare.
    TM_CAP = 16384
    MIN_STEPS = 4                  # keep both v7x TensorCores fed on big inputs
    if M <= 8:
        tm = M
    else:
        tm = min(TM_CAP, _round_up(pl.cdiv(M, MIN_STEPS), 8))
        if tm >= M:
            tm = M                 # small/medium input: one full-extent block
    grid = (pl.cdiv(M, tm),)

    itemsize = jnp.dtype(x.dtype).itemsize
    bytes_accessed = itemsize * N * E + 4 * L * R + itemsize * N

    out2d = pl.pallas_call(
        _atomic_energies_kernel,
        out_shape=jax.ShapeDtypeStruct((M, R), x.dtype),
        grid_spec=pltpu.PrefetchScalarGridSpec(
            num_scalar_prefetch=0,
            grid=grid,
            in_specs=[
                pl.BlockSpec((tm, L), lambda i: (i, 0)),   # streamed x row tiles
                pl.BlockSpec((L, R), lambda i: (0, 0)),    # resident weights
            ],
            out_specs=pl.BlockSpec((tm, R), lambda i: (i, 0)),
        ),
        compiler_params=pltpu.CompilerParams(
            dimension_semantics=("parallel",),
        ),
        cost_estimate=pl.CostEstimate(
            flops=2 * N * E, transcendentals=0, bytes_accessed=bytes_accessed
        ),
    )(x_view, w)

    # (M, R) row-major == (n_pad,) in original row order; drop padded rows.
    return out2d.reshape(n_pad)[:N]


# ---------------------------------------------------------------------------
# Module-level wrapper (mirrors AtomicEnergiesBlock)
# ---------------------------------------------------------------------------
class AtomicEnergiesBlockPallas:
    def __init__(self, atomic_energies):
        atomic_energies = jnp.asarray(atomic_energies, dtype=jnp.float32)
        assert atomic_energies.ndim == 1
        self.atomic_energies = atomic_energies

    def __call__(self, x):
        return atomic_energies_forward(x, self.atomic_energies)

    def __repr__(self):
        formatted = ", ".join(f"{float(v):.4f}" for v in self.atomic_energies)
        return f"{self.__class__.__name__}(energies=[{formatted}])"


# ---------------------------------------------------------------------------
# Reference (plain JAX) for verification
# ---------------------------------------------------------------------------
def ref_forward(x, atomic_energies):
    return x @ atomic_energies.astype(x.dtype)


if __name__ == "__main__":
    key = jax.random.PRNGKey(0)
    k_e, k_x1, k_x2, k_x3 = jax.random.split(key, 4)

    n_elements = 32
    energies = jax.random.normal(k_e, (n_elements,), jnp.float32)
    block = AtomicEnergiesBlockPallas(energies)

    # --- small case: single full-extent block, N divisible by R=4 ---
    n_small = 16
    x_small = jax.random.normal(k_x1, (n_small, n_elements), jnp.float32)
    out_small = jax.block_until_ready(block(x_small))
    assert out_small.shape == (n_small,)
    assert jnp.allclose(out_small, ref_forward(x_small, energies), atol=1e-5, rtol=1e-5)

    # --- padding case: N not a multiple of R ---
    n_ragged = 30
    x_ragged = jax.random.normal(k_x2, (n_ragged, n_elements), jnp.float32)
    out_ragged = jax.block_until_ready(block(x_ragged))
    assert out_ragged.shape == (n_ragged,)
    assert jnp.allclose(out_ragged, ref_forward(x_ragged, energies), atol=1e-5, rtol=1e-5)

    # --- multi-tile case: exercises the row-tiled grid + partial last tile ---
    n_big = 530
    x_big = jax.random.normal(k_x3, (n_big, n_elements), jnp.float32)
    out_big = jax.block_until_ready(block(x_big))
    assert out_big.shape == (n_big,)
    assert jnp.allclose(out_big, ref_forward(x_big, energies), atol=1e-5, rtol=1e-5)

    print("KERNEL_OK")
</pallas_src>

<mosaic_0001>
module attributes {stable_mosaic.version = 11 : i64} {
  func.func @_atomic_energies_kernel(%arg0: i32, %arg1: memref<4x128xf32, #tpu.memory_space<vmem>>, %arg2: memref<128x4xf32, #tpu.memory_space<vmem>>, %arg3: memref<4x4xf32, #tpu.memory_space<vmem>>) attributes {dimension_semantics = [#tpu.dimension_semantics<parallel>], iteration_bounds = array<i64: 1>, scalar_prefetch = 0 : i64, scratch_operands = 0 : i64, tpu.core_type = #tpu.core_type<tc>, window_params = [{transform_indices = @transform_0, window_bounds = array<i64: 4, 128>}, {pipeline_mode = #tpu.pipeline_mode<synchronous>, transform_indices = @transform_1, window_bounds = array<i64: 128, 4>}, {transform_indices = @transform_2, window_bounds = array<i64: 4, 4>}]} {
    %c0 = arith.constant 0 : index
    %c0_0 = arith.constant 0 : index
    %0 = vector.load %arg1[%c0, %c0_0] : memref<4x128xf32, #tpu.memory_space<vmem>>, vector<4x128xf32>
    %c0_1 = arith.constant 0 : index
    %c0_2 = arith.constant 0 : index
    %1 = vector.load %arg2[%c0_1, %c0_2] : memref<128x4xf32, #tpu.memory_space<vmem>>, vector<128x4xf32>
    %cst = arith.constant dense<0.000000e+00> : vector<4x4xf32>
    %2 = tpu.matmul %0, %1, %cst {dimension_numbers = #tpu.dot_dimension_numbers<[1], [0], [0], [1], [0, 0, 1, 1], [], []>} : vector<4x128xf32>, vector<128x4xf32>, vector<4x4xf32> -> vector<4x4xf32>
    %c0_3 = arith.constant 0 : index
    %c0_4 = arith.constant 0 : index
    %3 = vector.load %arg3[%c0_3, %c0_4] : memref<4x4xf32, #tpu.memory_space<vmem>>, vector<4x4xf32>
    tpu.vector_store %arg3[%c0_3, %c0_4], %2 {strides = array<i32>} : memref<4x4xf32, #tpu.memory_space<vmem>>, vector<4x4xf32>,
    return
  }
  func.func @transform_0(%arg0: i32) -> (i32, i32) {
    %c0_i32 = arith.constant 0 : i32
    %c0_i32_0 = arith.constant 0 : i32
    return %arg0, %c0_i32 : i32, i32
  }
  func.func @transform_1(%arg0: i32) -> (i32, i32) {
    %c0_i32 = arith.constant 0 : i32
    %c0_i32_0 = arith.constant 0 : i32
    %c0_i32_1 = arith.constant 0 : i32
    return %c0_i32, %c0_i32_0 : i32, i32
  }
  func.func @transform_2(%arg0: i32) -> (i32, i32) {
    %c0_i32 = arith.constant 0 : i32
    %c0_i32_0 = arith.constant 0 : i32
    return %arg0, %c0_i32 : i32, i32
  }
}

</mosaic_0001>

<bundles_post_ra>
// kernel: tpu_custom_call.1
= control target key start
LH: loop header
LB: loop body
LE: loop exit
PB: predicated region body
PF: predicated region fallthrough
CT: control target
= control target key end

     0   :  { %v192_v1 = vmov 0.0   ;;  %vm193_vm0 = vmmov 0   ;;  %s264_s0 = inlined_call_operand.vmem [shape: f32[4,128], index: 0, kind: input, shape index: {}]   ;;  %s265_s1 = inlined_call_operand.vmem [shape: f32[128,4], index: 1, kind: input, shape index: {}]   ;;  %s266_s2 = inlined_call_operand.hbm [shape: f32[4,4], index: 2, kind: output, shape index: {}]  }
   0x1   :  { %v28_v0 = vld [vmem:[%s265_s1 + $0x78] sm:$0xff]  ;;  %132 = vmatprep.subr.mxu0 %v192_v1  ;;  %v27_v2 = vld [vmem:[%s265_s1 + $0x70] sm:$0xff]  ;;  %164 = vmatprep.mubr.msk.f32.mxu0 %vm193_vm0, %v192_v1  ;;  %v26_v3 = vld [vmem:[%s265_s1 + $0x68] sm:$0xff] }
   0x2   :  { %133 = vmatpush3.msra.mxu0 %v28_v0  ;;  %v25_v4 = vld [vmem:[%s265_s1 + $0x60] sm:$0xff] }
   0x3   :  { %134 = vmatprep.subr.mxu0 %v192_v1 }
   0x4   :  { %135 = vmatpush3.msra.mxu0 %v27_v2 }
   0x5   :  { %136 = vmatprep.subr.mxu0 %v192_v1 }
   0x6   :  { %7 = vsyncpa [#allocation3], 0  ;;  %137 = vmatpush3.msra.mxu0 %v26_v3  ;;  %v24_v5 = vld [vmem:[%s265_s1 + $0x58] sm:$0xff]  ;;  %v23_v6 = vld [vmem:[%s265_s1 + $0x50] sm:$0xff]  ;;  %s194_s15 = smov [#allocation2]   ;;  %vm99_vm1 = vcmask 27648  }
   0x7   :  { %138 = vmatprep.subr.mxu0 %v192_v1  ;;  %v22_v7 = vld [vmem:[%s265_s1 + $0x48] sm:$0xff]  ;;  %v21_v8 = vld [vmem:[%s265_s1 + $0x40] sm:$0xff]  ;;  %v20_v9 = vld [vmem:[%s265_s1 + $0x38] sm:$0xff]  ;;  %s107_s16 = sshll.u32 %s194_s15, 4  ;;  %s108_s16 = int_to_ptr.vmem [resolvable:$true] %s107_s16 }
   0x8   :  { %139 = vmatpush3.msra.mxu0 %v25_v4  ;;  %v19_v10 = vld [vmem:[%s265_s1 + $0x30] sm:$0xff]  ;;  %v18_v11 = vld [vmem:[%s265_s1 + $0x28] sm:$0xff]  ;;  %v17_v12 = vld [vmem:[%s265_s1 + $0x20] sm:$0xff]  ;;  %s170_s17 = scalar_lea.vmem %s108_s16, 64  ;;  %p175_p1 = scmp.lt.s32.totalorder %s108_s16, %s108_s16 }
   0x9   :  { %140 = vmatprep.subr.mxu0 %v192_v1  ;;  %v16_v13 = vld [vmem:[%s265_s1 + $0x18] sm:$0xff]  ;;  %v15_v14 = vld [vmem:[%s265_s1 + $0x10] sm:$0xff]  ;;  %v14_v15 = vld [vmem:[%s265_s1 + $0x8] sm:$0xff]  ;;  %p171_p0 = scmp.ne.s32.totalorder %s108_s16, %s170_s17  ;;  %p176_p2 = scmp.lt.s32.totalorder %s170_s17, %s170_s17 }
   0xa   :  { %141 = vmatpush3.msra.mxu0 %v24_v5  ;;  %v13_v16 = vld [vmem:[%s265_s1] sm:$0xff] }
   0xb   :  { %142 = vmatprep.subr.mxu0 %v192_v1  ;;  %v12_v17 = vld [vmem:[%s264_s0] sm:$0xf]  ;;  %p177_p3 = por %p176_p2, %p175_p1 }
   0xc   :  { %143 = vmatpush3.msra.mxu0 %v23_v6 }
   0xd   :  { %144 = vmatprep.subr.mxu0 %v192_v1  ;;  %p178_p4 = pnand %p177_p3, %p171_p0 }
   0xe   :  { %145 = vmatpush3.msra.mxu0 %v22_v7 }
   0xf   :  { %146 = vmatprep.subr.mxu0 %v192_v1 }
  0x10   :  { %147 = vmatpush3.msra.mxu0 %v21_v8 }
  0x11   :  { %148 = vmatprep.subr.mxu0 %v192_v1 }
  0x12   :  { %149 = vmatpush3.msra.mxu0 %v20_v9 }
  0x13   :  { %150 = vmatprep.subr.mxu0 %v192_v1 }
  0x14   :  { %151 = vmatpush3.msra.mxu0 %v19_v10 }
  0x15   :  { %152 = vmatprep.subr.mxu0 %v192_v1 }
  0x16   :  { %153 = vmatpush3.msra.mxu0 %v18_v11 }
  0x17   :  { %154 = vmatprep.subr.mxu0 %v192_v1 }
  0x18   :  { %155 = vmatpush3.msra.mxu0 %v17_v12 }
  0x19   :  { %156 = vmatprep.subr.mxu0 %v192_v1 }
  0x1a   :  { %157 = vmatpush3.msra.mxu0 %v16_v13 }
  0x1b   :  { %158 = vmatprep.subr.mxu0 %v192_v1 }
  0x1c   :  { %159 = vmatpush3.msra.mxu0 %v15_v14 }
  0x1d   :  { %160 = vmatprep.subr.mxu0 %v192_v1 }
  0x1e   :  { %161 = vmatpush3.msra.mxu0 %v14_v15 }
  0x1f   :  { %162 = vmatprep.subr.mxu0 %v192_v1 }
  0x20   :  { %163 = vmatpush3.msra.mxu0 %v13_v16 }
  0x21   :  { %165 = vmatmul.mubr.f32.vlgmr.msra.gmra.mxu0 %v12_v17 }
  0xe1   :  { %v95_v18 = vpop.f32.mrf.mxu0 }
  0xe2   :  { %100 = vst.msk [vmem:[#allocation2] sm:$0xf] %vm99_vm1, %v95_v18 }
  0xe3   :  { %v166_v19 = vpop.f32.mrf.mxu0 }
  0xe4   :  { %181 = shalt.err (!%p178_p4)
}
  0xe5   :  { %110 = dma.vmem_to_hbm [thread:$0]  %s108_s16, 64, %s266_s2, [#allocation3]  }
  0xe6   :  { %190 = dma.done.wait [#allocation3], 64  }
  0xe7   :  { %191 = vsyncadd [#allocation3], 4294967232 }
  0xe8   :  { %114 = vsyncpa [#allocation3], 1 }

</bundles_post_ra>
